<compile_context>
chip_gen: v7x
topology: tpu7x:2x2x1
jax: 0.10.0
libtpu: 0.0.40
codegen_flags: <defaults>
</compile_context>

<pallas_src>
import math

import jax
import jax.numpy as jnp
from jax.experimental import pallas as pl
from jax.experimental.pallas import tpu as pltpu


# ---------------------------------------------------------------------------
# Pass 1: hoisted a-side projection.  Runs exactly once (not once per grid
# step): kva[j] = concat([k_a[j], v_a[j]], axis=-1).
# ---------------------------------------------------------------------------
def _proj_kernel(xa_ref, wkv_ref, kva_ref):
    # Single flattened dot_general: (Ba, Na, C) x (C, 2d) -> (Ba, Na, 2d).
    kva_ref[...] = jnp.einsum(
        "bnc,cd->bnd", xa_ref[...], wkv_ref[...],
        preferred_element_type=jnp.float32)


# ---------------------------------------------------------------------------
# Pass 2: fused b-side q/v projection + attention reconstruction against every
# a-batch + negative squared distance.  Each grid step handles TB query
# batches of `b` against all Ba key batches of `a`.
# ---------------------------------------------------------------------------
def _make_distance_kernel(d, Ba, Nb, TB):
    scale = 1.0 / math.sqrt(d)

    def kernel(xb_ref, kva_ref, wqv_ref, o_ref):
        kva = kva_ref[...]                       # (Ba, Na, 2d) resident
        ka = kva[..., :d]                        # (Ba, Na, d)
        va = kva[..., d:]                        # (Ba, Na, d)

        # Fused q/v projection for the TB query batches of this step: one
        # dot_general with effective M = TB * Nb (no per-batch weight copies).
        qv = jnp.einsum("tnc,cd->tnd", xb_ref[...], wqv_ref[...],
                        preferred_element_type=jnp.float32)   # (TB, Nb, 2d)

        rows = []
        for tb in range(TB):                     # static unroll; TB is small
            q_t = qv[tb, :, :d]                  # (Nb, d)
            v_t = qv[tb, :, d:]                  # (Nb, d)

            q_b = jnp.broadcast_to(q_t[None], (Ba, Nb, d))
            scores = jnp.einsum("bqd,bkd->bqk", q_b, ka,
                                preferred_element_type=jnp.float32) * scale
            scores = scores - jnp.max(scores, axis=-1, keepdims=True)
            p = jnp.exp(scores)                             # (Ba, Nb, Na)
            l = jnp.sum(p, axis=-1, keepdims=True)          # (Ba, Nb, 1)
            # drop_prob = 0.0 -> dropout is the identity.

            recon = jnp.einsum("bqk,bkd->bqd", p, va,
                               preferred_element_type=jnp.float32)  # (Ba, Nb, d)
            # Normalize AFTER the PV matmul: an (Ba, Nb, d) multiply with an
            # EUP reciprocal instead of an (Ba, Nb, Na) VPU divide.
            recon = recon * pl.reciprocal(l, approx=True)

            diff = v_t[None] - recon                        # (Ba, Nb, d)
            sq = jnp.sum(diff * diff, axis=2)               # (Ba, Nb)
            rows.append(-jnp.sum(sq, axis=1)[None, :])      # (1, Ba)

        o_ref[...] = jnp.concatenate(rows, axis=0)[None]    # (1, TB, Ba)

        # TODO(synk): for large N (= H*W), tile the key axis Na on a second
        # "arbitrary" grid axis with an online-softmax accumulator (and tile
        # Ba) instead of materializing the (Ba, Nb, Na) score block; add
        # pipeline_mode=pl.Buffered(1) on the constant kva / weight specs to
        # halve their VMEM footprint on v7x's 64 MiB.

    return kernel


# ---------------------------------------------------------------------------
# Full CLARM forward (wrapper glue + the two pallas_calls)
# ---------------------------------------------------------------------------
def clarm_forward(features_a, features_b, w_qkv, inner_size, query_block=None):
    d = inner_size
    Ba, C, Ha, Wa = features_a.shape
    Bb, Cb, Hb, Wb = features_b.shape
    assert Cb == C
    Na = Ha * Wa
    Nb = Hb * Wb

    # NCHW -> (B, N, C)   (matches .view(B, C, -1).permute(0, 2, 1))
    xa = features_a.reshape(Ba, C, Na).transpose(0, 2, 1).astype(jnp.float32)
    xb = features_b.reshape(Bb, C, Nb).transpose(0, 2, 1).astype(jnp.float32)

    # nn.Linear weight is (3d, C); y = x @ W.T.  Rows: [0:d]=q, [d:2d]=k, [2d:]=v.
    w_t = jnp.transpose(w_qkv).astype(jnp.float32)            # (C, 3d)
    w_kv_a = w_t[:, d:]                                       # (C, 2d): [wk | wv]
    w_qv_b = jnp.concatenate([w_t[:, :d], w_t[:, 2 * d:]], axis=1)  # (C, 2d): [wq | wv]

    # ---- Pass 1: a-side k/v projection, executed once. ----
    kva = pl.pallas_call(
        _proj_kernel,
        out_shape=jax.ShapeDtypeStruct((Ba, Na, 2 * d), jnp.float32),
        grid=(1,),
        in_specs=[
            pl.BlockSpec((Ba, Na, C), lambda i: (0, 0, 0)),
            pl.BlockSpec((C, 2 * d), lambda i: (0, 0)),
        ],
        out_specs=pl.BlockSpec((Ba, Na, 2 * d), lambda i: (0, 0, 0)),
        compiler_params=pltpu.CompilerParams(
            dimension_semantics=("arbitrary",),
            vmem_limit_bytes=32 * 1024 * 1024),
    )(xa, w_kv_a)

    # ---- Pass 2: distances, TB query batches per grid step. ----
    if query_block is None:
        # Two grid steps by default so both v7x TensorCores get work; on
        # single-core v5e/v6e the extra step costs well under a microsecond.
        query_block = max(1, pl.cdiv(Bb, 2))
    TB = min(query_block, Bb)
    num_steps = pl.cdiv(Bb, TB)
    Bb_pad = num_steps * TB
    if Bb_pad != Bb:
        xb = jnp.pad(xb, ((0, Bb_pad - Bb), (0, 0), (0, 0)))

    out3 = pl.pallas_call(
        _make_distance_kernel(d, Ba, Nb, TB),
        out_shape=jax.ShapeDtypeStruct((num_steps, TB, Ba), jnp.float32),
        grid=(num_steps,),
        in_specs=[
            pl.BlockSpec((TB, Nb, C), lambda i: (i, 0, 0)),       # xb tile i
            pl.BlockSpec((Ba, Na, 2 * d), lambda i: (0, 0, 0)),   # kva (VMEM-resident)
            pl.BlockSpec((C, 2 * d), lambda i: (0, 0)),           # w_qv (VMEM-resident)
        ],
        out_specs=pl.BlockSpec((1, TB, Ba), lambda i: (i, 0, 0)),
        compiler_params=pltpu.CompilerParams(
            dimension_semantics=("parallel",),
            vmem_limit_bytes=32 * 1024 * 1024),
    )(xb, kva, w_qv_b)

    return out3.reshape(Bb_pad, Ba)[:Bb]


# Pure-JAX reference (mirrors the PyTorch math) for verification.
def clarm_reference(features_a, features_b, w_qkv, inner_size):
    d = inner_size
    Ba, C = features_a.shape[0], features_a.shape[1]
    Bb = features_b.shape[0]
    xa = features_a.reshape(Ba, C, -1).transpose(0, 2, 1)
    xb = features_b.reshape(Bb, C, -1).transpose(0, 2, 1)
    qkv_a = xa @ w_qkv.T
    qkv_b = xb @ w_qkv.T
    ka, va = qkv_a[..., d:2 * d], qkv_a[..., 2 * d:]
    qb, vb = qkv_b[..., :d], qkv_b[..., 2 * d:]
    scores = jnp.einsum("ind,jmd->ijnm", qb, ka) / math.sqrt(d)
    probs = jax.nn.softmax(scores, axis=-1)
    recon = jnp.einsum("ijnm,jmd->ijnd", probs, va)
    diff = vb[:, None] - recon
    return -jnp.sum(diff * diff, axis=(-1, -2))


if __name__ == "__main__":
    hidden_size = 32
    inner_size = 8
    Ba, Bb, H, W = 2, 3, 5, 5          # num_patch = H*W = 25 (module default)

    key = jax.random.PRNGKey(0)
    k1, k2, k3 = jax.random.split(key, 3)
    features_a = jax.random.normal(k1, (Ba, hidden_size, H, W), jnp.float32)
    features_b = jax.random.normal(k2, (Bb, hidden_size, H, W), jnp.float32)
    # to_qkv Linear weight: (3 * inner_size, hidden_size), bias=False
    w_qkv = jax.random.normal(k3, (3 * inner_size, hidden_size), jnp.float32) \
        * (1.0 / math.sqrt(hidden_size))

    sim = clarm_forward(features_a, features_b, w_qkv, inner_size)
    sim = jax.block_until_ready(sim)

    ref = clarm_reference(features_a, features_b, w_qkv, inner_size)
    assert sim.shape == (Bb, Ba), sim.shape
    assert jnp.allclose(sim, ref, atol=1e-3, rtol=1e-3), (sim, ref)

    print("KERNEL_OK")
</pallas_src>

<mosaic_0001>
module attributes {stable_mosaic.version = 11 : i64} {
  func.func @_proj_kernel(%arg0: i32, %arg1: memref<2x25x32xf32, #tpu.memory_space<vmem>>, %arg2: memref<32x16xf32, #tpu.memory_space<vmem>>, %arg3: memref<2x25x16xf32, #tpu.memory_space<vmem>>) attributes {dimension_semantics = [#tpu.dimension_semantics<arbitrary>], iteration_bounds = array<i64: 1>, scalar_prefetch = 0 : i64, scratch_operands = 0 : i64, tpu.core_type = #tpu.core_type<tc>, window_params = [{pipeline_mode = #tpu.pipeline_mode<synchronous>, transform_indices = @transform_0, window_bounds = array<i64: 2, 25, 32>}, {pipeline_mode = #tpu.pipeline_mode<synchronous>, transform_indices = @transform_1, window_bounds = array<i64: 32, 16>}, {pipeline_mode = #tpu.pipeline_mode<synchronous>, transform_indices = @transform_2, window_bounds = array<i64: 2, 25, 16>}]} {
    %c0 = arith.constant 0 : index
    %c0_0 = arith.constant 0 : index
    %c0_1 = arith.constant 0 : index
    %0 = vector.load %arg1[%c0, %c0_0, %c0_1] : memref<2x25x32xf32, #tpu.memory_space<vmem>>, vector<2x25x32xf32>
    %c0_2 = arith.constant 0 : index
    %c0_3 = arith.constant 0 : index
    %1 = vector.load %arg2[%c0_2, %c0_3] : memref<32x16xf32, #tpu.memory_space<vmem>>, vector<32x16xf32>
    "tpu.trace_start"() <{level = 10 : i32, message = "bnc,cd->bnd"}> : () -> ()
    %cst = arith.constant dense<0.000000e+00> : vector<2x25x16xf32>
    %2 = tpu.matmul %0, %1, %cst {dimension_numbers = #tpu.dot_dimension_numbers<[2], [0], [0, 1], [1], [0, 0, 0, 1, 1, 1], [], []>} : vector<2x25x32xf32>, vector<32x16xf32>, vector<2x25x16xf32> -> vector<2x25x16xf32>
    "tpu.trace_stop"() : () -> ()
    %c0_4 = arith.constant 0 : index
    %c0_5 = arith.constant 0 : index
    %c0_6 = arith.constant 0 : index
    %3 = vector.load %arg3[%c0_4, %c0_5, %c0_6] : memref<2x25x16xf32, #tpu.memory_space<vmem>>, vector<2x25x16xf32>
    tpu.vector_store %arg3[%c0_4, %c0_5, %c0_6], %2 {strides = array<i32>} : memref<2x25x16xf32, #tpu.memory_space<vmem>>, vector<2x25x16xf32>,
    return
  }
  func.func @transform_0(%arg0: i32) -> (i32, i32, i32) {
    %c0_i32 = arith.constant 0 : i32
    %c0_i32_0 = arith.constant 0 : i32
    %c0_i32_1 = arith.constant 0 : i32
    %c0_i32_2 = arith.constant 0 : i32
    return %c0_i32, %c0_i32_0, %c0_i32_1 : i32, i32, i32
  }
  func.func @transform_1(%arg0: i32) -> (i32, i32) {
    %c0_i32 = arith.constant 0 : i32
    %c0_i32_0 = arith.constant 0 : i32
    %c0_i32_1 = arith.constant 0 : i32
    return %c0_i32, %c0_i32_0 : i32, i32
  }
  func.func @transform_2(%arg0: i32) -> (i32, i32, i32) {
    %c0_i32 = arith.constant 0 : i32
    %c0_i32_0 = arith.constant 0 : i32
    %c0_i32_1 = arith.constant 0 : i32
    %c0_i32_2 = arith.constant 0 : i32
    return %c0_i32, %c0_i32_0, %c0_i32_1 : i32, i32, i32
  }
}

</mosaic_0001>

<bundles_post_ra>
// kernel: tpu_custom_call.1
= control target key start
LH: loop header
LB: loop body
LE: loop exit
PB: predicated region body
PF: predicated region fallthrough
CT: control target
= control target key end

     0   :  { %v1525_v0 = vmov 0.0|0.0   ;;  %v1526_v4 = vmov 1966171168   ;;  %v35_v6 = vlaneseq  ;;  %vm1527_vm0 = vmmov 0   ;;  %s1826_s1 = inlined_call_operand.vmem [shape: f32[32,16], index: 1, kind: input, shape index: {}]   ;;  %s1827_s0 = inlined_call_operand.vmem [shape: f32[2,25,32], index: 0, kind: input, shape index: {}]   ;;  %s1828_s2 = inlined_call_operand.vmem [shape: f32[2,25,16], index: 2, kind: output, shape index: {}]  }
   0x1   :  { %1505 = vmatprep.subr.bf16.mxu0 %v1525_v0  ;;  %v19_v1 = vld [vmem:[%s1826_s1] sm:$0xff]  ;;  %v20_v2 = vld [vmem:[%s1826_s1 + $0x8] sm:$0xff]  ;;  %1511 = vmatprep.subr.bf16.mxu1 %v1525_v0  ;;  %v21_v3 = vld [vmem:[%s1826_s1 + $0x10] sm:$0xff]  ;;  %v33_v5 = vunpack.c.l.s4 %v1526_v4  ;;  %v1528_v9 = vmov 0.0   ;;  %vm662_vm1 = vcmask 261120   ;;  %vm1430_vm2 = vcmask 130048  }
   0x2   :  { %v1506_v7 = vpack.c.bf16 %v20_v2, %v19_v1  ;;  %v22_v8 = vld [vmem:[%s1826_s1 + $0x18] sm:$0xff]  ;;  %1484 = vmatprep.mubr.msk.f32.mxu0 %vm1527_vm0, %v1528_v9  ;;  %v11_v10 = vld [vmem:[%s1827_s0] sm:$0xff]  ;;  %1496 = vmatprep.mubr.msk.f32.mxu1 %vm1527_vm0, %v1528_v9  ;;  %v12_v11 = vld [vmem:[%s1827_s0 + $0x8] sm:$0xff]  ;;  %v36_v15 = vshrl.u32 %v35_v6, 7  ;;  %vm1434_vm3 = vcmask 122880  }
   0x3   :  { %v1509_v12 = vpack.c.bf16 %v22_v8, %v21_v3  ;;  %v31_v13 = vcombine.high %v11_v10, %v11_v10  ;;  %v34_v14 = vunpack.c.0.s8 %v33_v5  ;;  %v1569_v16 = vld [vmem:[%s1827_s0 + $0x20] sm:$0xff]  ;;  %v16_v17 = vld [vmem:[%s1827_s0 + $0x28] sm:$0xff]  ;;  %v1577_v18 = vld [vmem:[%s1827_s0 + $0x10] sm:$0xff]  ;;  %v80_v19 = vcombine.high %v12_v11, %v12_v11 }
   0x4   :  { %1507 = vmatpush3.bf16.msra.mxu0 %v1506_v7  ;;  %1513 = vmatpush3.bf16.msra.mxu1 %v1506_v7  ;;  %v192_v20 = vcombine.high %v1569_v16, %v1569_v16  ;;  %v241_v21 = vcombine.high %v16_v17, %v16_v17  ;;  %v1584_v22 = vld [vmem:[%s1827_s0 + $0x30] sm:$0xff]  ;;  %v129_v24 = vcombine.high %v1577_v18, %v1577_v18 }
   0x5   :  { %1508 = vmatprep.subr.bf16.mxu0 %v1525_v0  ;;  %1512 = vmatprep.subr.bf16.mxu1 %v1525_v0  ;;  %v1586_v23 = vsub.s32 %v34_v14, %v36_v15  ;;  %v290_v25 = vcombine.high %v1584_v22, %v1584_v22 }
   0x7   :  { %v38_v26 = vrot.slane %v11_v10, %v1586_v23  ;;  %v45_v27 = vrot.slane %v31_v13, %v1586_v23  ;;  %v87_v28 = vrot.slane %v12_v11, %v1586_v23  ;;  %v94_v29 = vrot.slane %v80_v19, %v1586_v23 }
   0x8   :  { %1510 = vmatpush3.bf16.msra.mxu0 %v1509_v12  ;;  %1514 = vmatpush3.bf16.msra.mxu1 %v1509_v12  ;;  %v1597_v30 = vrot.slane %v192_v20, %v1586_v23  ;;  %v248_v31 = vrot.slane %v16_v17, %v1586_v23  ;;  %v255_v32 = vrot.slane %v241_v21, %v1586_v23 }
   0x9   :  { %v46_v33 = vcombine.high %v38_v26, %v38_v26  ;;  %v47_v34 = vcombine.high %v45_v27, %v45_v27  ;;  %v54_v35 = vrot.slane %v38_v26, %v1586_v23  ;;  %v61_v36 = vrot.slane %v45_v27, %v1586_v23 }
   0xa   :  { %v95_v37 = vcombine.high %v87_v28, %v87_v28  ;;  %v96_v38 = vcombine.high %v94_v29, %v94_v29  ;;  %v103_v39 = vrot.slane %v87_v28, %v1586_v23  ;;  %v110_v40 = vrot.slane %v94_v29, %v1586_v23 }
   0xb   :  { %v68_v41 = vrot.slane %v46_v33, %v1586_v23  ;;  %v75_v42 = vrot.slane %v47_v34, %v1586_v23  ;;  %v208_v43 = vcombine.high %v1597_v30, %v1597_v30  ;;  %v256_v44 = vcombine.high %v248_v31, %v248_v31 }
   0xc   :  { %v117_v45 = vrot.slane %v95_v37, %v1586_v23  ;;  %v124_v46 = vrot.slane %v96_v38, %v1586_v23  ;;  %v257_v47 = vcombine.high %v255_v32, %v255_v32  ;;  %v264_v48 = vrot.slane %v248_v31, %v1586_v23  ;;  %v1444_v37 = vld.sshfl [vmem:[%s1827_s0 + $0x18] sm:$0x1 pattern:$0x75316420] }
   0xd   :  { %v353_v49 = vcombine.low %v54_v35, %v68_v41  ;;  %v1446_v50 = vcombine.high %v54_v35, %v68_v41  ;;  %v355_v51 = vcombine.low %v61_v36, %v75_v42  ;;  %v1447_v52 = vcombine.high %v61_v36, %v75_v42 }
   0xe   :  { %v402_v53 = vcombine.low %v103_v39, %v117_v45  ;;  %v1448_v54 = vcombine.high %v103_v39, %v117_v45  ;;  %v404_v55 = vcombine.low %v110_v40, %v124_v46  ;;  %v1449_v56 = vcombine.high %v110_v40, %v124_v46 }
   0xf   :  { %v363_v57 = vrot.slane %v353_v49, %v1586_v23  ;;  %v370_v58 = vrot.slane %v1446_v50, %v1586_v23  ;;  %v377_v59 = vrot.slane %v355_v51, %v1586_v23  ;;  %v384_v60 = vrot.slane %v1447_v52, %v1586_v23 }
  0x10   :  { %v412_v61 = vrot.slane %v402_v53, %v1586_v23  ;;  %v419_v62 = vrot.slane %v1448_v54, %v1586_v23  ;;  %v426_v63 = vrot.slane %v404_v55, %v1586_v23  ;;  %v433_v0 = vrot.slane %v1449_v56, %v1586_v23 }
  0x11   :  { %v385_v1 = vcombine.low %v363_v57, %v370_v58  ;;  %v386_v2 = vcombine.low %v377_v59, %v384_v60  ;;  %v1621_v3 = vrot.slane %v208_v43, %v1586_v23  ;;  %v271_v4 = vrot.slane %v255_v32, %v1586_v23 }
  0x12   :  { %v434_v5 = vcombine.low %v412_v61, %v419_v62  ;;  %v435_v6 = vcombine.low %v426_v63, %v433_v0  ;;  %v278_v7 = vrot.slane %v256_v44, %v1586_v23  ;;  %v285_v8 = vrot.slane %v257_v47, %v1586_v23 }
  0x13   :  { %v393_v10 = vrot.slane %v385_v1, %v1586_v23  ;;  %v400_v11 = vrot.slane %v386_v2, %v1586_v23  ;;  %v240_v12 = vcombine.high %v1621_v3, %v1621_v3  ;;  %v286_v13 = vcombine.high %v264_v48, %v264_v48 }
  0x14   :  { %v442_v14 = vrot.slane %v434_v5, %v1586_v23  ;;  %v449_v15 = vrot.slane %v435_v6, %v1586_v23  ;;  %v287_v17 = vcombine.high %v271_v4, %v271_v4  ;;  %v288_v19 = vcombine.high %v278_v7, %v278_v7 }
  0x15   :  { %v401_v20 = vcombine.low %v393_v10, %v400_v11  ;;  %v549_v21 = vcombine.low %v240_v12, %v264_v48  ;;  %v550_v26 = vcombine.low %v278_v7, %v286_v13  ;;  %v136_v27 = vrot.slane %v1577_v18, %v1586_v23 }
  0x16   :  { %v450_v28 = vcombine.low %v442_v14, %v449_v15  ;;  %v551_v29 = vcombine.low %v288_v19, %v271_v4  ;;  %v552_v31 = vcombine.low %v285_v8, %v287_v17  ;;  %v143_v32 = vrot.slane %v129_v24, %v1586_v23 }
  0x17   :  { %1485 = vmatmul.mubr.msk.f32.vlgmr.msra.gmra.mrb[0].mxu0 %vm662_vm1, %v401_v20  ;;  %v559_v33 = vrot.slane %v549_v21, %v1586_v23  ;;  %v566_v34 = vrot.slane %v550_v26, %v1586_v23  ;;  %v144_v35 = vcombine.high %v136_v27, %v136_v27  ;;  %v152_v36 = vrot.slane %v136_v27, %v1586_v23  ;;  %v1445_v21 = vld.sshfl [vmem:[%s1827_s0 + $0x38] sm:$0x1 pattern:$0x75316420] }
  0x18   :  { %1487 = vmatprep.mubr.msk.f32.mxu0 %vm1527_vm0, %v1528_v9  ;;  %v573_v38 = vrot.slane %v551_v29, %v1586_v23  ;;  %v580_v18 = vrot.slane %v552_v31, %v1586_v23  ;;  %v145_v24 = vcombine.high %v143_v32, %v143_v32  ;;  %v159_v39 = vrot.slane %v143_v32, %v1586_v23 }
  0x19   :  { %v581_v40 = vcombine.low %v559_v33, %v566_v34  ;;  %v166_v41 = vrot.slane %v144_v35, %v1586_v23  ;;  %v289_v42 = vcombine.high %v285_v8, %v285_v8  ;;  %v297_v43 = vrot.slane %v1584_v22, %v1586_v23 }
  0x1a   :  { %v582_v44 = vcombine.low %v573_v38, %v580_v18  ;;  %v173_v45 = vrot.slane %v145_v24, %v1586_v23  ;;  %v304_v46 = vrot.slane %v290_v25, %v1586_v23  ;;  %v191_v47 = vrot.slane %v1444_v37, %v1586_v23 }
  0x1b   :  { %1488 = vmatmul.mubr.msk.f32.gmra.mrb[2].mxu0 %vm662_vm1, %v450_v28  ;;  %v589_v48 = vrot.slane %v581_v40, %v1586_v23  ;;  %v451_v49 = vcombine.low %v152_v36, %v166_v41  ;;  %v1450_v50 = vcombine.high %v152_v36, %v166_v41  ;;  %v305_v51 = vcombine.high %v297_v43, %v297_v43 }
  0x1c   :  { %v596_v52 = vrot.slane %v582_v44, %v1586_v23  ;;  %1490 = vmatprep.mubr.msk.f32.mxu0 %vm1527_vm0, %v1528_v9  ;;  %v453_v53 = vcombine.low %v159_v39, %v173_v45  ;;  %v1451_v54 = vcombine.high %v159_v39, %v173_v45  ;;  %v306_v55 = vcombine.high %v304_v46, %v304_v46 }
  0x1d   :  { %v461_v22 = vrot.slane %v451_v49, %v1586_v23  ;;  %v468_v25 = vrot.slane %v1450_v50, %v1586_v23  ;;  %v313_v56 = vrot.slane %v297_v43, %v1586_v23  ;;  %v320_v57 = vrot.slane %v304_v46, %v1586_v23 }
  0x1e   :  { %v597_v58 = vcombine.low %v589_v48, %v596_v52  ;;  %v475_v59 = vrot.slane %v453_v53, %v1586_v23  ;;  %v482_v60 = vrot.slane %v1451_v54, %v1586_v23  ;;  %v327_v61 = vrot.slane %v305_v51, %v1586_v23 }
  0x1f   :  { %v483_v62 = vcombine.low %v461_v22, %v468_v25  ;;  %v334_v63 = vrot.slane %v306_v55, %v1586_v23  ;;  %v335_v0 = vcombine.high %v313_v56, %v313_v56  ;;  %v336_v1 = vcombine.high %v320_v57, %v320_v57 }
  0x20   :  { %1497 = vmatmul.mubr.msk.f32.vlgmr.msra.gmra.mrb[0].mxu1 %vm662_vm1, %v597_v58  ;;  %v484_v2 = vcombine.low %v475_v59, %v482_v60  ;;  %v337_v4 = vcombine.high %v327_v61, %v327_v61  ;;  %v598_v5 = vcombine.low %v289_v42, %v313_v56  ;;  %v199_v6 = vrot.slane %v1569_v16, %v1586_v23 }
  0x21   :  { %1499 = vmatprep.mubr.msk.f32.mxu1 %vm1527_vm0, %v1528_v9  ;;  %v491_v7 = vrot.slane %v483_v62, %v1586_v23  ;;  %v599_v8 = vcombine.low %v327_v61, %v335_v0  ;;  %v601_v10 = vcombine.low %v334_v63, %v336_v1  ;;  %v222_v11 = vrot.slane %v1597_v30, %v1586_v23 }
  0x22   :  { %v498_v12 = vrot.slane %v484_v2, %v1586_v23  ;;  %v600_v13 = vcombine.low %v337_v4, %v320_v57  ;;  %v608_v14 = vrot.slane %v598_v5, %v1586_v23  ;;  %v207_v15 = vcombine.high %v199_v6, %v199_v6 }
  0x23   :  { %v615_v17 = vrot.slane %v599_v8, %v1586_v23  ;;  %v629_v16 = vrot.slane %v601_v10, %v1586_v23  ;;  %v215_v19 = vrot.slane %v199_v6, %v1586_v23  ;;  %v238_v20 = vcombine.high %v222_v11, %v222_v11 }
  0x24   :  { %v499_v26 = vcombine.low %v491_v7, %v498_v12  ;;  %v622_v30 = vrot.slane %v600_v13, %v1586_v23  ;;  %v229_v27 = vrot.slane %v207_v15, %v1586_v23  ;;  %v338_v28 = vcombine.high %v334_v63, %v334_v63 }
  0x25   :  { %v630_v29 = vcombine.low %v608_v14, %v615_v17  ;;  %v237_v31 = vcombine.high %v215_v19, %v215_v19  ;;  %v500_v32 = vcombine.low %v191_v47, %v215_v19  ;;  %v503_v33 = vcombine.low %v1621_v3, %v238_v20 }
  0x26   :  { %1491 = vmatmul.mubr.msk.f32.gmra.mrb[4].mxu0 %vm662_vm1, %v499_v26  ;;  %v631_v34 = vcombine.low %v622_v30, %v629_v16  ;;  %v239_v35 = vcombine.high %v229_v27, %v229_v27  ;;  %v352_v36 = vrot.slane %v1445_v21, %v1586_v23 }
  0x27   :  { %v638_v37 = vrot.slane %v630_v29, %v1586_v23  ;;  %1493 = vmatprep.mubr.msk.f32.mxu0 %vm1527_vm0, %v1528_v9  ;;  %v501_v38 = vcombine.low %v229_v27, %v237_v31  ;;  %v510_v18 = vrot.slane %v500_v32, %v1586_v23  ;;  %v531_v40 = vrot.slane %v503_v33, %v1586_v23 }
  0x28   :  { %v645_v24 = vrot.slane %v631_v34, %v1586_v23  ;;  %v502_v39 = vcombine.low %v239_v35, %v222_v11  ;;  %v647_v3 = vcombine.low %v338_v28, %v352_v36 }
  0x29   :  { %v517_v41 = vrot.slane %v501_v38, %v1586_v23 }
  0x2a   :  { %v646_v42 = vcombine.low %v638_v37, %v645_v24  ;;  %v524_v43 = vrot.slane %v502_v39, %v1586_v23  ;;  %v654_v44 = vrot.slane %v647_v3, %v1586_v23 }
  0x2b   :  { %v532_v45 = vcombine.low %v510_v18, %v517_v41 }
  0x2c   :  { %1500 = vmatmul.mubr.msk.f32.gmra.mrb[2].mxu1 %vm662_vm1, %v646_v42  ;;  %v533_v46 = vcombine.low %v524_v43, %v531_v40  ;;  %v661_v47 = vrot.slane %v654_v44, %v1586_v23 }
  0x2d   :  { %v540_v48 = vrot.slane %v532_v45, %v1586_v23  ;;  %1502 = vmatprep.mubr.msk.f32.mxu1 %vm1527_vm0, %v1528_v9 }
  0x2e   :  { %v547_v49 = vrot.slane %v533_v46, %v1586_v23 }
  0x30   :  { %v548_v50 = vcombine.low %v540_v48, %v547_v49  ;;  %1503 = vmatmul.mubr.msk.f32.gmra.mrb[4].mxu1 %vm662_vm1, %v661_v47 }
  0x32   :  { %1494 = vmatmul.mubr.msk.f32.gmra.mrb[6].mxu0 %vm662_vm1, %v548_v50 }
  0xea   :  { %v743_v51 = vpop.f32.mrb[0].mxu0 }
  0xeb   :  { %v784_v52 = vcombine.high %v743_v51, %v743_v51  ;;  %v791_v53 = vrot.slane %v743_v51, %v1586_v23  ;;  %v1486_v54 = vpop.f32.mrb[1].mxu0 }
  0xed   :  { %v798_v55 = vrot.slane %v784_v52, %v1586_v23  ;;  %v799_v22 = vcombine.high %v791_v53, %v791_v53  ;;  %v807_v57 = vrot.slane %v791_v53, %v1586_v23 }
  0xee   :  { %v748_v25 = vpop.f32.mrb[2].mxu0 }
  0xef   :  { %v800_v56 = vcombine.high %v798_v55, %v798_v55  ;;  %v821_v9 = vrot.slane %v799_v22, %v1586_v23  ;;  %v833_v58 = vcombine.high %v748_v25, %v748_v25  ;;  %v1489_v59 = vpop.f32.mrb[3].mxu0  ;;  %v814_v60 = vrot.slane %v798_v55, %v1586_v23 }
  0xf0   :  { %v840_v61 = vrot.slane %v748_v25, %v1586_v23 }
  0xf1   :  { %v828_v62 = vrot.slane %v800_v56, %v1586_v23  ;;  %v1100_v63 = vcombine.low %v807_v57, %v821_v9  ;;  %v1459_v0 = vcombine.high %v807_v57, %v821_v9  ;;  %v847_v1 = vrot.slane %v833_v58, %v1586_v23 }
  0xf2   :  { %v848_v2 = vcombine.high %v840_v61, %v840_v61  ;;  %v856_v4 = vrot.slane %v840_v61, %v1586_v23 }
  0xf3   :  { %v1102_v5 = vcombine.low %v814_v60, %v828_v62  ;;  %v1460_v6 = vcombine.high %v814_v60, %v828_v62  ;;  %v1110_v7 = vrot.slane %v1100_v63, %v1586_v23  ;;  %v1117_v8 = vrot.slane %v1459_v0, %v1586_v23  ;;  %v763_v10 = vpop.f32.mrb[0].mxu1 }
  0xf4   :  { %v849_v11 = vcombine.high %v847_v1, %v847_v1  ;;  %v863_v12 = vrot.slane %v847_v1, %v1586_v23  ;;  %v870_v13 = vrot.slane %v848_v2, %v1586_v23  ;;  %v980_v14 = vcombine.high %v763_v10, %v763_v10  ;;  %v1498_v15 = vpop.f32.mrb[1].mxu1 }
  0xf5   :  { %v1124_v17 = vrot.slane %v1102_v5, %v1586_v23  ;;  %v1131_v16 = vrot.slane %v1460_v6, %v1586_v23  ;;  %v1132_v19 = vcombine.low %v1110_v7, %v1117_v8  ;;  %v987_v20 = vrot.slane %v763_v10, %v1586_v23 }
  0xf6   :  { %v877_v21 = vrot.slane %v849_v11, %v1586_v23  ;;  %v1149_v26 = vcombine.low %v856_v4, %v870_v13  ;;  %v1461_v30 = vcombine.high %v856_v4, %v870_v13  ;;  %v994_v27 = vrot.slane %v980_v14, %v1586_v23 }
  0xf7   :  { %v1133_v28 = vcombine.low %v1124_v17, %v1131_v16  ;;  %v1140_v29 = vrot.slane %v1132_v19, %v1586_v23  ;;  %v995_v31 = vcombine.high %v987_v20, %v987_v20  ;;  %v1730_v32 = vrot.slane %v987_v20, %v1586_v23 }
  0xf8   :  { %v1151_v33 = vcombine.low %v863_v12, %v877_v21  ;;  %v1462_v34 = vcombine.high %v863_v12, %v877_v21  ;;  %v1159_v35 = vrot.slane %v1149_v26, %v1586_v23  ;;  %v1166_v36 = vrot.slane %v1461_v30, %v1586_v23 }
  0xf9   :  { %v1147_v37 = vrot.slane %v1133_v28, %v1586_v23  ;;  %v996_v38 = vcombine.high %v994_v27, %v994_v27  ;;  %v1010_v18 = vrot.slane %v994_v27, %v1586_v23  ;;  %v1017_v24 = vrot.slane %v995_v31, %v1586_v23  ;;  %v753_v39 = vpop.f32.mrb[4].mxu0 }
  0xfa   :  { %v1173_v40 = vrot.slane %v1151_v33, %v1586_v23  ;;  %v1180_v3 = vrot.slane %v1462_v34, %v1586_v23  ;;  %v1181_v41 = vcombine.low %v1159_v35, %v1166_v36  ;;  %v1025_v42 = vcombine.high %v1730_v32, %v1730_v32  ;;  %v1492_v43 = vpop.f32.mrb[5].mxu0 }
  0xfb   :  { %v1148_v44 = vcombine.low %v1140_v29, %v1147_v37  ;;  %v1027_v45 = vcombine.high %v1017_v24, %v1017_v24  ;;  %v882_v48 = vcombine.high %v753_v39, %v753_v39  ;;  %v1026_v49 = vcombine.high %v1010_v18, %v1010_v18 }
  0xfc   :  { %v1182_v46 = vcombine.low %v1173_v40, %v1180_v3  ;;  %v1310_v47 = vcombine.low %v1017_v24, %v1025_v42  ;;  %v889_v51 = vrot.slane %v753_v39, %v1586_v23  ;;  %v1189_v52 = vrot.slane %v1181_v41, %v1586_v23 }
  0xfd   :  { %1431 = vst.msk [vmem:[%s1828_s2] sm:$0xff] %vm1430_vm2, %v1148_v44  ;;  %v1311_v50 = vcombine.low %v1027_v45, %v1010_v18  ;;  %v1024_v54 = vrot.slane %v996_v38, %v1586_v23  ;;  %v896_v55 = vrot.slane %v882_v48, %v1586_v23 }
  0xfe   :  { %v1196_v53 = vrot.slane %v1182_v46, %v1586_v23  ;;  %v1320_v22 = vrot.slane %v1310_v47, %v1586_v23  ;;  %v897_v56 = vcombine.high %v889_v51, %v889_v51  ;;  %v905_v62 = vrot.slane %v889_v51, %v1586_v23 }
  0xff   :  { %v1327_v25 = vrot.slane %v1311_v50, %v1586_v23  ;;  %v768_v57 = vpop.f32.mrb[2].mxu1  ;;  %v898_v58 = vcombine.high %v896_v55, %v896_v55  ;;  %v1312_v61 = vcombine.low %v1024_v54, %v1026_v49  ;;  %v912_v1 = vrot.slane %v896_v55, %v1586_v23 }
 0x100   :  { %v1197_v9 = vcombine.low %v1189_v52, %v1196_v53  ;;  %v1029_v59 = vcombine.high %v768_v57, %v768_v57  ;;  %v1501_v60 = vpop.f32.mrb[3].mxu1  ;;  %v919_v63 = vrot.slane %v897_v56, %v1586_v23  ;;  %v1036_v0 = vrot.slane %v768_v57, %v1586_v23 }
 0x101   :  { %v926_v2 = vrot.slane %v898_v58, %v1586_v23  ;;  %v1028_v4 = vcombine.high %v1024_v54, %v1024_v54  ;;  %v1342_v6 = vcombine.low %v1320_v22, %v1327_v25  ;;  %v1334_v29 = vrot.slane %v1312_v61, %v1586_v23 }
 0x102   :  { %1432 = vst.msk [vmem:[%s1828_s2 + $0x8] sm:$0xff] %vm1430_vm2, %v1197_v9  ;;  %v1043_v5 = vrot.slane %v1029_v59, %v1586_v23  ;;  %v1198_v7 = vcombine.low %v905_v62, %v919_v63  ;;  %v1463_v8 = vcombine.high %v905_v62, %v919_v63  ;;  %v1044_v10 = vcombine.high %v1036_v0, %v1036_v0 }
 0x103   :  { %v773_v11 = vpop.f32.mrb[4].mxu1  ;;  %v1200_v12 = vcombine.low %v912_v1, %v926_v2  ;;  %v1464_v13 = vcombine.high %v912_v1, %v926_v2  ;;  %v1052_v15 = vrot.slane %v1036_v0, %v1586_v23  ;;  %v1350_v39 = vrot.slane %v1342_v6, %v1586_v23 }
 0x104   :  { %v1045_v14 = vcombine.high %v1043_v5, %v1043_v5  ;;  %v1504_v17 = vpop.f32.mrb[5].mxu1  ;;  %v1208_v16 = vrot.slane %v1198_v7, %v1586_v23  ;;  %v1215_v19 = vrot.slane %v1463_v8, %v1586_v23  ;;  %v1059_v20 = vrot.slane %v1043_v5, %v1586_v23 }
 0x105   :  { %v1066_v21 = vrot.slane %v1044_v10, %v1586_v23  ;;  %v758_v26 = vpop.f32.mrb[6].mxu0  ;;  %v1222_v30 = vrot.slane %v1200_v12, %v1586_v23  ;;  %v1229_v27 = vrot.slane %v1464_v13, %v1586_v23  ;;  %v1074_v28 = vcombine.high %v1052_v15, %v1052_v15 }
 0x106   :  { %v1495_v31 = vpop.f32.mrb[7].mxu0  ;;  %v1230_v33 = vcombine.low %v1208_v16, %v1215_v19  ;;  %v1075_v34 = vcombine.high %v1059_v20, %v1059_v20  ;;  %v1313_v36 = vcombine.low %v1028_v4, %v1052_v15  ;;  %v931_v18 = vcombine.high %v758_v26, %v758_v26 }
 0x107   :  { %v1076_v35 = vcombine.high %v1066_v21, %v1066_v21  ;;  %v1231_v37 = vcombine.low %v1222_v30, %v1229_v27  ;;  %v1359_v38 = vcombine.low %v1066_v21, %v1074_v28  ;;  %v938_v24 = vrot.slane %v758_v26, %v1586_v23 }
 0x108   :  { %v1073_v40 = vrot.slane %v1045_v14, %v1586_v23  ;;  %v1341_v3 = vrot.slane %v1313_v36, %v1586_v23  ;;  %v1238_v42 = vrot.slane %v1230_v33, %v1586_v23  ;;  %v945_v44 = vrot.slane %v931_v18, %v1586_v23 }
 0x109   :  { %v1360_v41 = vcombine.low %v1076_v35, %v1059_v20  ;;  %v1245_v43 = vrot.slane %v1231_v37, %v1586_v23  ;;  %v946_v45 = vcombine.high %v938_v24, %v938_v24  ;;  %v1369_v48 = vrot.slane %v1359_v38, %v1586_v23 }
 0x10a   :  { %v1343_v46 = vcombine.low %v1334_v29, %v1341_v3  ;;  %v1361_v47 = vcombine.low %v1073_v40, %v1075_v34  ;;  %v954_v49 = vrot.slane %v938_v24, %v1586_v23  ;;  %v947_v51 = vcombine.high %v945_v44, %v945_v44 }
 0x10b   :  { %v1246_v50 = vcombine.low %v1238_v42, %v1245_v43  ;;  %v961_v52 = vrot.slane %v945_v44, %v1586_v23  ;;  %v968_v53 = vrot.slane %v946_v45, %v1586_v23  ;;  %v1376_v55 = vrot.slane %v1360_v41, %v1586_v23 }
 0x10c   :  { %v1357_v54 = vrot.slane %v1343_v46, %v1586_v23  ;;  %v976_v22 = vcombine.high %v954_v49, %v954_v49  ;;  %v1253_v25 = vrot.slane %v954_v49, %v1586_v23  ;;  %v975_v56 = vrot.slane %v947_v51, %v1586_v23 }
 0x10d   :  { %1433 = vst.msk [vmem:[%s1828_s2 + $0x10] sm:$0xff] %vm1430_vm2, %v1246_v50  ;;  %v977_v57 = vcombine.high %v961_v52, %v961_v52  ;;  %v978_v9 = vcombine.high %v968_v53, %v968_v53  ;;  %v1084_v58 = vrot.slane %v773_v11, %v1586_v23  ;;  %v1077_v62 = vcombine.high %v1073_v40, %v1073_v40 }
 0x10e   :  { %v1358_v59 = vcombine.low %v1350_v39, %v1357_v54  ;;  %v1260_v60 = vrot.slane %v1253_v25, %v1586_v23  ;;  %v1261_v61 = vcombine.low %v968_v53, %v976_v22  ;;  %v979_v63 = vcombine.high %v975_v56, %v975_v56 }
 0x10f   :  { %v1262_v0 = vcombine.low %v978_v9, %v961_v52  ;;  %v1263_v1 = vcombine.low %v975_v56, %v977_v57  ;;  %v1085_v2 = vcombine.high %v1084_v58, %v1084_v58  ;;  %v1092_v4 = vrot.slane %v1084_v58, %v1586_v23 }
 0x110   :  { %1437 = vst.msk [vmem:[%s1828_s2 + $0x28] sm:$0xff] %vm1430_vm2, %v1358_v59  ;;  %v1264_v5 = vcombine.low %v979_v63, %v1730_v32  ;;  %v1271_v6 = vrot.slane %v1261_v61, %v1586_v23  ;;  %v1391_v10 = vcombine.low %v1369_v48, %v1376_v55  ;;  %v1383_v12 = vrot.slane %v1361_v47, %v1586_v23 }
 0x111   :  { %1435 = vst.msk [vmem:[%s1828_s2 + $0x18] sm:$0x1] %vm1434_vm3, %v1260_v60  ;;  %v1278_v7 = vrot.slane %v1262_v0, %v1586_v23  ;;  %v1099_v8 = vrot.slane %v1085_v2, %v1586_v23  ;;  %v1362_v11 = vcombine.low %v1077_v62, %v1092_v4  ;;  %v1285_v13 = vrot.slane %v1263_v1, %v1586_v23 }
 0x112   :  { %v1292_v14 = vrot.slane %v1264_v5, %v1586_v23  ;;  %v1399_v20 = vrot.slane %v1391_v10, %v1586_v23 }
 0x113   :  { %v1293_v15 = vcombine.low %v1271_v6, %v1278_v7  ;;  %v1414_v17 = vrot.slane %v1099_v8, %v1586_v23  ;;  %v1390_v16 = vrot.slane %v1362_v11, %v1586_v23 }
 0x114   :  { %v1294_v32 = vcombine.low %v1285_v13, %v1292_v14 }
 0x115   :  { %v1421_v19 = vrot.slane %v1414_v17, %v1586_v23  ;;  %v1392_v21 = vcombine.low %v1383_v12, %v1390_v16  ;;  %v1301_v26 = vrot.slane %v1293_v15, %v1586_v23 }
 0x116   :  { %v1308_v30 = vrot.slane %v1294_v32, %v1586_v23 }
 0x117   :  { %1439 = vst.msk [vmem:[%s1828_s2 + $0x38] sm:$0x1] %vm1434_vm3, %v1421_v19  ;;  %v1406_v27 = vrot.slane %v1392_v21, %v1586_v23 }
 0x118   :  { %v1309_v28 = vcombine.low %v1301_v26, %v1308_v30 }
 0x119   :  { %v1407_v29 = vcombine.low %v1399_v20, %v1406_v27 }
 0x11a   :  { %1436 = vst.msk [vmem:[%s1828_s2 + $0x20] sm:$0xff] %vm1430_vm2, %v1309_v28 }
 0x11b   :  { %1438 = vst.msk [vmem:[%s1828_s2 + $0x30] sm:$0xff] %vm1430_vm2, %v1407_v29 }

</bundles_post_ra>
